<compile_context>
chip_gen: v7x
topology: tpu7x:2x2x1
jax: 0.10.0
libtpu: 0.0.40
codegen_flags: <defaults>
</compile_context>

<pallas_src>
import functools
import math

import jax
import jax.numpy as jnp
from jax.experimental import pallas as pl
from jax.experimental.pallas import tpu as pltpu

LANE = 128
_INV_SQRT2 = 1.0 / math.sqrt(2.0)


def _pad_to(n, m):
    return ((n + m - 1) // m) * m


# ----------------------------- helpers (traced inside the kernel) ------------

def _gelu_exact(x):
    # matches torch.nn.functional.gelu default (erf form)
    return 0.5 * x * (1.0 + jax.lax.erf(x * _INV_SQRT2))


def _layernorm_padded(x, gamma, beta, n_real, eps=1e-12):
    # `x` is zero in the padded lanes beyond n_real, so plain sums over the
    # padded axis divided by n_real give the exact unpadded mean / E[x^2].
    inv_n = 1.0 / float(n_real)
    mean = jnp.sum(x, axis=-1, keepdims=True) * inv_n
    mean_sq = jnp.sum(x * x, axis=-1, keepdims=True) * inv_n
    var = mean_sq - mean * mean
    # gamma/beta are zero in padded lanes -> padded output lanes stay zero.
    return (x - mean) * jax.lax.rsqrt(var + eps) * gamma + beta


# ----------------------------- fused encoder + heads kernel ------------------

def fused_model_kernel(*refs, B, S, H, train, drop_p):
    if train:
        (seed_ref, x_ref, wq_ref, wk_ref, wv_ref, wo_ref,
         ln1_g_ref, ln1_b_ref, w1_ref, b1_ref, w2_ref, b2_ref,
         ln2_g_ref, ln2_b_ref, wh_ref, bh_ref, out_ref) = refs
    else:
        (x_ref, wq_ref, wk_ref, wv_ref, wo_ref,
         ln1_g_ref, ln1_b_ref, w1_ref, b1_ref, w2_ref, b2_ref,
         ln2_g_ref, ln2_b_ref, wh_ref, bh_ref, out_ref) = refs

    x = x_ref[...]                               # (B*S, Hp) f32, zero beyond H
    Hp = x.shape[-1]
    scale = 1.0 / math.sqrt(float(H))            # synthetic single-head scale

    # ---- batch-independent projections on the flattened (B*S, Hp) slab ----
    q = jnp.dot(x, wq_ref[...], preferred_element_type=jnp.float32)
    k = jnp.dot(x, wk_ref[...], preferred_element_type=jnp.float32)
    v = jnp.dot(x, wv_ref[...], preferred_element_type=jnp.float32)

    qb = q.reshape(B, S, Hp)
    kb = k.reshape(B, S, Hp)
    vb = v.reshape(B, S, Hp)

    # ---- per-batch attention (tiny SxS) ----
    s = jnp.einsum('bqd,bkd->bqk', qb, kb,
                   preferred_element_type=jnp.float32) * scale
    s = s - jnp.max(s, axis=-1, keepdims=True)
    p = jnp.exp(s)
    p = p * pl.reciprocal(jnp.sum(p, axis=-1, keepdims=True), approx=True)
    ctx = jnp.einsum('bqk,bkd->bqd', p, vb,
                     preferred_element_type=jnp.float32).reshape(B * S, Hp)

    attn = jnp.dot(ctx, wo_ref[...], preferred_element_type=jnp.float32)
    h = _layernorm_padded(x + attn, ln1_g_ref[...], ln1_b_ref[...], H)

    # ---- FFN ----
    ffn = jnp.dot(
        _gelu_exact(jnp.dot(h, w1_ref[...], preferred_element_type=jnp.float32)
                    + b1_ref[...]),
        w2_ref[...], preferred_element_type=jnp.float32) + b2_ref[...]
    hidden = _layernorm_padded(h + ffn, ln2_g_ref[...], ln2_b_ref[...], H)

    # ---- head path: gelu -> (dropout) -> fused punc||case linear ----
    g = _gelu_exact(hidden)
    if train:
        pltpu.prng_seed(seed_ref[0])
        bits = pltpu.bitcast(pltpu.prng_random_bits(g.shape), jnp.uint32)
        thresh = jnp.uint32(min(2 ** 32 - 1, int(round(drop_p * 2 ** 32))))
        keep = (bits >= thresh).astype(g.dtype)
        g = g * keep * jnp.float32(1.0 / (1.0 - drop_p))
    # (eval mode: nn.Dropout is identity)

    out_ref[...] = (jnp.dot(g, wh_ref[...], preferred_element_type=jnp.float32)
                    + bh_ref[...]).astype(out_ref.dtype)


# ----------------------------- full model forward ----------------------------

def model_forward(token_ids, padded, *, train=False, drop_p=0.3, seed=0):
    B, S = token_ids.shape
    H, Hp = padded["H"], padded["Hp"]
    n_punc, n_case = padded["n_punc"], padded["n_case"]
    OUTP = padded["wh"].shape[1]

    # glue: embedding lookup (word + positional) for the synthetic encoder
    emb = padded["tok_emb"][token_ids] + padded["pos_emb"][:S][None, :, :]
    x = emb.reshape(B * S, Hp).astype(jnp.float32)

    kern = functools.partial(fused_model_kernel, B=B, S=S, H=H,
                             train=train, drop_p=drop_p)
    arrays = (x, padded["wq"], padded["wk"], padded["wv"], padded["wo"],
              padded["ln1_g"], padded["ln1_b"],
              padded["w1"], padded["b1"], padded["w2"], padded["b2"],
              padded["ln2_g"], padded["ln2_b"],
              padded["wh"], padded["bh"])

    out_shape = jax.ShapeDtypeStruct((B * S, OUTP), jnp.float32)
    vmem = pl.BlockSpec(memory_space=pltpu.MemorySpace.VMEM)

    if train:
        seed_arr = jnp.array([seed], dtype=jnp.int32)
        in_specs = ([pl.BlockSpec(memory_space=pltpu.MemorySpace.SMEM)]
                    + [vmem] * len(arrays))
        out = pl.pallas_call(kern, out_shape=out_shape,
                             in_specs=in_specs, out_specs=vmem)(seed_arr, *arrays)
    else:
        in_specs = [vmem] * len(arrays)
        out = pl.pallas_call(kern, out_shape=out_shape,
                             in_specs=in_specs, out_specs=vmem)(*arrays)

    punc = out[:, :n_punc].reshape(B, S, n_punc)
    case = out[:, n_punc:n_punc + n_case].reshape(B, S, n_case)
    return punc, case


# ----------------------------- parameter init + lane padding -----------------

def init_params(key, *, vocab=100, max_seq=16, H=32, F=64, n_punc=5, n_case=4):
    ks = jax.random.split(key, 12)
    n = lambda k, s, sc=0.02: (sc * jax.random.normal(k, s)).astype(jnp.float32)
    return {
        "H": H, "F": F, "n_punc": n_punc, "n_case": n_case,
        "tok_emb": n(ks[0], (vocab, H)),
        "pos_emb": n(ks[1], (max_seq, H)),
        "wq": n(ks[2], (H, H)), "wk": n(ks[3], (H, H)),
        "wv": n(ks[4], (H, H)), "wo": n(ks[5], (H, H)),
        "ln1_g": jnp.ones((H,), jnp.float32), "ln1_b": jnp.zeros((H,), jnp.float32),
        "w1": n(ks[6], (H, F)), "b1": jnp.zeros((F,), jnp.float32),
        "w2": n(ks[7], (F, H)), "b2": jnp.zeros((H,), jnp.float32),
        "ln2_g": jnp.ones((H,), jnp.float32), "ln2_b": jnp.zeros((H,), jnp.float32),
        # heads in torch nn.Linear layout (out_features, in_features)
        "punc_w": n(ks[8], (n_punc, H), 0.1), "punc_b": n(ks[9], (n_punc,), 0.1),
        "case_w": n(ks[10], (n_case, H), 0.1), "case_b": n(ks[11], (n_case,), 0.1),
    }


def pad_params(p):
    """Zero-pad every feature axis to a multiple of 128 lanes and fuse heads."""
    H, F = p["H"], p["F"]
    n_punc, n_case = p["n_punc"], p["n_case"]
    Hp, Fp = _pad_to(H, LANE), _pad_to(F, LANE)
    OUTP = _pad_to(n_punc + n_case, LANE)

    def pad2(a, r, c):
        return jnp.zeros((r, c), jnp.float32).at[:a.shape[0], :a.shape[1]].set(a)

    def pad_row(a, c):                       # (n,) -> (1, c)
        return jnp.zeros((1, c), jnp.float32).at[0, :a.shape[0]].set(a)

    # fused punc||case head: y = x @ W.T + b   (nn.Linear stores (out, in))
    wh = jnp.concatenate([p["punc_w"].T, p["case_w"].T], axis=1)   # (H, 9)
    bh = jnp.concatenate([p["punc_b"], p["case_b"]], axis=0)       # (9,)

    return {
        "H": H, "Hp": Hp, "n_punc": n_punc, "n_case": n_case,
        "tok_emb": pad2(p["tok_emb"], p["tok_emb"].shape[0], Hp),
        "pos_emb": pad2(p["pos_emb"], p["pos_emb"].shape[0], Hp),
        "wq": pad2(p["wq"], Hp, Hp), "wk": pad2(p["wk"], Hp, Hp),
        "wv": pad2(p["wv"], Hp, Hp), "wo": pad2(p["wo"], Hp, Hp),
        "ln1_g": pad_row(p["ln1_g"], Hp), "ln1_b": pad_row(p["ln1_b"], Hp),
        "w1": pad2(p["w1"], Hp, Fp), "b1": pad_row(p["b1"], Fp),
        "w2": pad2(p["w2"], Fp, Hp), "b2": pad_row(p["b2"], Hp),
        "ln2_g": pad_row(p["ln2_g"], Hp), "ln2_b": pad_row(p["ln2_b"], Hp),
        "wh": pad2(wh, Hp, OUTP), "bh": pad_row(bh, OUTP),
    }


if __name__ == "__main__":
    B, S, H, F, VOCAB = 2, 8, 32, 64, 100
    key = jax.random.PRNGKey(0)
    pkey, xkey = jax.random.split(key)

    params = init_params(pkey, vocab=VOCAB, max_seq=S, H=H, F=F)
    padded = pad_params(params)
    x = jax.random.randint(xkey, (B, S), 0, VOCAB, dtype=jnp.int32)

    punc, case_logits = model_forward(x, padded, train=False)   # eval: dropout = id
    jax.block_until_ready((punc, case_logits))

    assert punc.shape == (B, S, 5) and punc.dtype == jnp.float32
    assert case_logits.shape == (B, S, 4) and case_logits.dtype == jnp.float32
    assert bool(jnp.all(jnp.isfinite(punc))) and bool(jnp.all(jnp.isfinite(case_logits)))
    print("KERNEL_OK")
</pallas_src>

<mosaic_0001>
module attributes {stable_mosaic.version = 11 : i64} {
  func.func @fused_model_kernel(%arg0: memref<16x128xf32, #tpu.memory_space<vmem>>, %arg1: memref<128x128xf32, #tpu.memory_space<vmem>>, %arg2: memref<128x128xf32, #tpu.memory_space<vmem>>, %arg3: memref<128x128xf32, #tpu.memory_space<vmem>>, %arg4: memref<128x128xf32, #tpu.memory_space<vmem>>, %arg5: memref<1x128xf32, #tpu.memory_space<vmem>>, %arg6: memref<1x128xf32, #tpu.memory_space<vmem>>, %arg7: memref<128x128xf32, #tpu.memory_space<vmem>>, %arg8: memref<1x128xf32, #tpu.memory_space<vmem>>, %arg9: memref<128x128xf32, #tpu.memory_space<vmem>>, %arg10: memref<1x128xf32, #tpu.memory_space<vmem>>, %arg11: memref<1x128xf32, #tpu.memory_space<vmem>>, %arg12: memref<1x128xf32, #tpu.memory_space<vmem>>, %arg13: memref<128x128xf32, #tpu.memory_space<vmem>>, %arg14: memref<1x128xf32, #tpu.memory_space<vmem>>, %arg15: memref<16x128xf32, #tpu.memory_space<vmem>>) attributes {dimension_semantics = [], scalar_prefetch = 0 : i64, scratch_operands = 0 : i64, tpu.core_type = #tpu.core_type<tc>} {
    %c0 = arith.constant 0 : index
    %c0_0 = arith.constant 0 : index
    %0 = vector.load %arg0[%c0, %c0_0] : memref<16x128xf32, #tpu.memory_space<vmem>>, vector<16x128xf32>
    %c0_1 = arith.constant 0 : index
    %c0_2 = arith.constant 0 : index
    %1 = vector.load %arg1[%c0_1, %c0_2] : memref<128x128xf32, #tpu.memory_space<vmem>>, vector<128x128xf32>
    %cst = arith.constant dense<0.000000e+00> : vector<16x128xf32>
    %2 = tpu.matmul %0, %1, %cst {dimension_numbers = #tpu.dot_dimension_numbers<[1], [0], [0], [1], [0, 0, 1, 1], [], []>} : vector<16x128xf32>, vector<128x128xf32>, vector<16x128xf32> -> vector<16x128xf32>
    %c0_3 = arith.constant 0 : index
    %c0_4 = arith.constant 0 : index
    %3 = vector.load %arg2[%c0_3, %c0_4] : memref<128x128xf32, #tpu.memory_space<vmem>>, vector<128x128xf32>
    %cst_5 = arith.constant dense<0.000000e+00> : vector<16x128xf32>
    %4 = tpu.matmul %0, %3, %cst_5 {dimension_numbers = #tpu.dot_dimension_numbers<[1], [0], [0], [1], [0, 0, 1, 1], [], []>} : vector<16x128xf32>, vector<128x128xf32>, vector<16x128xf32> -> vector<16x128xf32>
    %c0_6 = arith.constant 0 : index
    %c0_7 = arith.constant 0 : index
    %5 = vector.load %arg3[%c0_6, %c0_7] : memref<128x128xf32, #tpu.memory_space<vmem>>, vector<128x128xf32>
    %cst_8 = arith.constant dense<0.000000e+00> : vector<16x128xf32>
    %6 = tpu.matmul %0, %5, %cst_8 {dimension_numbers = #tpu.dot_dimension_numbers<[1], [0], [0], [1], [0, 0, 1, 1], [], []>} : vector<16x128xf32>, vector<128x128xf32>, vector<16x128xf32> -> vector<16x128xf32>
    %7 = vector.shape_cast %2 : vector<16x128xf32> to vector<2x8x128xf32>
    %8 = vector.shape_cast %4 : vector<16x128xf32> to vector<2x8x128xf32>
    %9 = vector.shape_cast %6 : vector<16x128xf32> to vector<2x8x128xf32>
    "tpu.trace_start"() <{level = 10 : i32, message = "bqd,bkd->bqk"}> : () -> ()
    %cst_9 = arith.constant dense<0.000000e+00> : vector<2x8x8xf32>
    %10 = tpu.matmul %7, %8, %cst_9 {dimension_numbers = #tpu.dot_dimension_numbers<[2], [2], [1], [1], [0, 0, 0, 1, 1, 1], [0], [0]>} : vector<2x8x128xf32>, vector<2x8x128xf32>, vector<2x8x8xf32> -> vector<2x8x8xf32>
    "tpu.trace_stop"() : () -> ()
    %cst_10 = arith.constant 0.176776692 : f32
    %11 = vector.broadcast %cst_10 : f32 to vector<2x8x8xf32>
    %12 = arith.mulf %10, %11 : vector<2x8x8xf32>
    %cst_11 = arith.constant dense<0xFF800000> : vector<2x8xf32>
    %13 = vector.multi_reduction <maximumf>, %12, %cst_11 [2] : vector<2x8x8xf32> to vector<2x8xf32>
    %14 = vector.shape_cast %13 : vector<2x8xf32> to vector<2x8x1xf32>
    %15 = vector.broadcast %14 : vector<2x8x1xf32> to vector<2x8x8xf32>
    %16 = arith.subf %12, %15 : vector<2x8x8xf32>
    %17 = math.exp %16 : vector<2x8x8xf32>
    %cst_12 = arith.constant dense<0.000000e+00> : vector<2x8xf32>
    %18 = vector.multi_reduction <add>, %17, %cst_12 [2] : vector<2x8x8xf32> to vector<2x8xf32>
    %19 = vector.shape_cast %18 : vector<2x8xf32> to vector<2x8x1xf32>
    %20 = tpu.reciprocal %19 {approx = true} : vector<2x8x1xf32> -> vector<2x8x1xf32>
    %21 = vector.broadcast %20 : vector<2x8x1xf32> to vector<2x8x8xf32>
    %22 = arith.mulf %17, %21 : vector<2x8x8xf32>
    "tpu.trace_start"() <{level = 10 : i32, message = "bqk,bkd->bqd"}> : () -> ()
    %cst_13 = arith.constant dense<0.000000e+00> : vector<2x8x128xf32>
    %23 = tpu.matmul %22, %9, %cst_13 {dimension_numbers = #tpu.dot_dimension_numbers<[2], [1], [1], [2], [0, 0, 0, 1, 1, 2], [0], [0]>} : vector<2x8x8xf32>, vector<2x8x128xf32>, vector<2x8x128xf32> -> vector<2x8x128xf32>
    "tpu.trace_stop"() : () -> ()
    %24 = vector.shape_cast %23 : vector<2x8x128xf32> to vector<16x128xf32>
    %c0_14 = arith.constant 0 : index
    %c0_15 = arith.constant 0 : index
    %25 = vector.load %arg4[%c0_14, %c0_15] : memref<128x128xf32, #tpu.memory_space<vmem>>, vector<128x128xf32>
    %cst_16 = arith.constant dense<0.000000e+00> : vector<16x128xf32>
    %26 = tpu.matmul %24, %25, %cst_16 {dimension_numbers = #tpu.dot_dimension_numbers<[1], [0], [0], [1], [0, 0, 1, 1], [], []>} : vector<16x128xf32>, vector<128x128xf32>, vector<16x128xf32> -> vector<16x128xf32>
    %27 = arith.addf %0, %26 : vector<16x128xf32>
    %c0_17 = arith.constant 0 : index
    %c0_18 = arith.constant 0 : index
    %28 = vector.load %arg5[%c0_17, %c0_18] : memref<1x128xf32, #tpu.memory_space<vmem>>, vector<1x128xf32>
    %c0_19 = arith.constant 0 : index
    %c0_20 = arith.constant 0 : index
    %29 = vector.load %arg6[%c0_19, %c0_20] : memref<1x128xf32, #tpu.memory_space<vmem>>, vector<1x128xf32>
    %cst_21 = arith.constant dense<0.000000e+00> : vector<16xf32>
    %30 = vector.multi_reduction <add>, %27, %cst_21 [1] : vector<16x128xf32> to vector<16xf32>
    %31 = vector.shape_cast %30 : vector<16xf32> to vector<16x1xf32>
    %cst_22 = arith.constant 3.125000e-02 : f32
    %32 = vector.broadcast %cst_22 : f32 to vector<16x1xf32>
    %33 = arith.mulf %31, %32 : vector<16x1xf32>
    %34 = arith.mulf %27, %27 : vector<16x128xf32>
    %cst_23 = arith.constant dense<0.000000e+00> : vector<16xf32>
    %35 = vector.multi_reduction <add>, %34, %cst_23 [1] : vector<16x128xf32> to vector<16xf32>
    %36 = vector.shape_cast %35 : vector<16xf32> to vector<16x1xf32>
    %cst_24 = arith.constant 3.125000e-02 : f32
    %37 = vector.broadcast %cst_24 : f32 to vector<16x1xf32>
    %38 = arith.mulf %36, %37 : vector<16x1xf32>
    %39 = arith.mulf %33, %33 : vector<16x1xf32>
    %40 = arith.subf %38, %39 : vector<16x1xf32>
    %41 = vector.broadcast %33 : vector<16x1xf32> to vector<16x128xf32>
    %42 = arith.subf %27, %41 : vector<16x128xf32>
    %cst_25 = arith.constant 9.99999996E-13 : f32
    %43 = vector.broadcast %cst_25 : f32 to vector<16x1xf32>
    %44 = arith.addf %40, %43 : vector<16x1xf32>
    %45 = math.rsqrt %44 : vector<16x1xf32>
    %46 = vector.broadcast %45 : vector<16x1xf32> to vector<16x128xf32>
    %47 = arith.mulf %42, %46 : vector<16x128xf32>
    %48 = vector.broadcast %28 : vector<1x128xf32> to vector<16x128xf32>
    %49 = arith.mulf %47, %48 : vector<16x128xf32>
    %50 = vector.broadcast %29 : vector<1x128xf32> to vector<16x128xf32>
    %51 = arith.addf %49, %50 : vector<16x128xf32>
    %c0_26 = arith.constant 0 : index
    %c0_27 = arith.constant 0 : index
    %52 = vector.load %arg7[%c0_26, %c0_27] : memref<128x128xf32, #tpu.memory_space<vmem>>, vector<128x128xf32>
    %cst_28 = arith.constant dense<0.000000e+00> : vector<16x128xf32>
    %53 = tpu.matmul %51, %52, %cst_28 {dimension_numbers = #tpu.dot_dimension_numbers<[1], [0], [0], [1], [0, 0, 1, 1], [], []>} : vector<16x128xf32>, vector<128x128xf32>, vector<16x128xf32> -> vector<16x128xf32>
    %c0_29 = arith.constant 0 : index
    %c0_30 = arith.constant 0 : index
    %54 = vector.load %arg8[%c0_29, %c0_30] : memref<1x128xf32, #tpu.memory_space<vmem>>, vector<1x128xf32>
    %55 = vector.broadcast %54 : vector<1x128xf32> to vector<16x128xf32>
    %56 = arith.addf %53, %55 : vector<16x128xf32>
    %cst_31 = arith.constant 5.000000e-01 : f32
    %57 = vector.broadcast %cst_31 : f32 to vector<16x128xf32>
    %58 = arith.mulf %57, %56 : vector<16x128xf32>
    %cst_32 = arith.constant 0.707106769 : f32
    %59 = vector.broadcast %cst_32 : f32 to vector<16x128xf32>
    %60 = arith.mulf %56, %59 : vector<16x128xf32>
    %61 = math.erf %60 : vector<16x128xf32>
    %cst_33 = arith.constant 1.000000e+00 : f32
    %62 = vector.broadcast %cst_33 : f32 to vector<16x128xf32>
    %63 = arith.addf %62, %61 : vector<16x128xf32>
    %64 = arith.mulf %58, %63 : vector<16x128xf32>
    %c0_34 = arith.constant 0 : index
    %c0_35 = arith.constant 0 : index
    %65 = vector.load %arg9[%c0_34, %c0_35] : memref<128x128xf32, #tpu.memory_space<vmem>>, vector<128x128xf32>
    %cst_36 = arith.constant dense<0.000000e+00> : vector<16x128xf32>
    %66 = tpu.matmul %64, %65, %cst_36 {dimension_numbers = #tpu.dot_dimension_numbers<[1], [0], [0], [1], [0, 0, 1, 1], [], []>} : vector<16x128xf32>, vector<128x128xf32>, vector<16x128xf32> -> vector<16x128xf32>
    %c0_37 = arith.constant 0 : index
    %c0_38 = arith.constant 0 : index
    %67 = vector.load %arg10[%c0_37, %c0_38] : memref<1x128xf32, #tpu.memory_space<vmem>>, vector<1x128xf32>
    %68 = vector.broadcast %67 : vector<1x128xf32> to vector<16x128xf32>
    %69 = arith.addf %66, %68 : vector<16x128xf32>
    %70 = arith.addf %51, %69 : vector<16x128xf32>
    %c0_39 = arith.constant 0 : index
    %c0_40 = arith.constant 0 : index
    %71 = vector.load %arg11[%c0_39, %c0_40] : memref<1x128xf32, #tpu.memory_space<vmem>>, vector<1x128xf32>
    %c0_41 = arith.constant 0 : index
    %c0_42 = arith.constant 0 : index
    %72 = vector.load %arg12[%c0_41, %c0_42] : memref<1x128xf32, #tpu.memory_space<vmem>>, vector<1x128xf32>
    %cst_43 = arith.constant dense<0.000000e+00> : vector<16xf32>
    %73 = vector.multi_reduction <add>, %70, %cst_43 [1] : vector<16x128xf32> to vector<16xf32>
    %74 = vector.shape_cast %73 : vector<16xf32> to vector<16x1xf32>
    %cst_44 = arith.constant 3.125000e-02 : f32
    %75 = vector.broadcast %cst_44 : f32 to vector<16x1xf32>
    %76 = arith.mulf %74, %75 : vector<16x1xf32>
    %77 = arith.mulf %70, %70 : vector<16x128xf32>
    %cst_45 = arith.constant dense<0.000000e+00> : vector<16xf32>
    %78 = vector.multi_reduction <add>, %77, %cst_45 [1] : vector<16x128xf32> to vector<16xf32>
    %79 = vector.shape_cast %78 : vector<16xf32> to vector<16x1xf32>
    %cst_46 = arith.constant 3.125000e-02 : f32
    %80 = vector.broadcast %cst_46 : f32 to vector<16x1xf32>
    %81 = arith.mulf %79, %80 : vector<16x1xf32>
    %82 = arith.mulf %76, %76 : vector<16x1xf32>
    %83 = arith.subf %81, %82 : vector<16x1xf32>
    %84 = vector.broadcast %76 : vector<16x1xf32> to vector<16x128xf32>
    %85 = arith.subf %70, %84 : vector<16x128xf32>
    %cst_47 = arith.constant 9.99999996E-13 : f32
    %86 = vector.broadcast %cst_47 : f32 to vector<16x1xf32>
    %87 = arith.addf %83, %86 : vector<16x1xf32>
    %88 = math.rsqrt %87 : vector<16x1xf32>
    %89 = vector.broadcast %88 : vector<16x1xf32> to vector<16x128xf32>
    %90 = arith.mulf %85, %89 : vector<16x128xf32>
    %91 = vector.broadcast %71 : vector<1x128xf32> to vector<16x128xf32>
    %92 = arith.mulf %90, %91 : vector<16x128xf32>
    %93 = vector.broadcast %72 : vector<1x128xf32> to vector<16x128xf32>
    %94 = arith.addf %92, %93 : vector<16x128xf32>
    %cst_48 = arith.constant 5.000000e-01 : f32
    %95 = vector.broadcast %cst_48 : f32 to vector<16x128xf32>
    %96 = arith.mulf %95, %94 : vector<16x128xf32>
    %cst_49 = arith.constant 0.707106769 : f32
    %97 = vector.broadcast %cst_49 : f32 to vector<16x128xf32>
    %98 = arith.mulf %94, %97 : vector<16x128xf32>
    %99 = math.erf %98 : vector<16x128xf32>
    %cst_50 = arith.constant 1.000000e+00 : f32
    %100 = vector.broadcast %cst_50 : f32 to vector<16x128xf32>
    %101 = arith.addf %100, %99 : vector<16x128xf32>
    %102 = arith.mulf %96, %101 : vector<16x128xf32>
    %c0_51 = arith.constant 0 : index
    %c0_52 = arith.constant 0 : index
    %103 = vector.load %arg13[%c0_51, %c0_52] : memref<128x128xf32, #tpu.memory_space<vmem>>, vector<128x128xf32>
    %cst_53 = arith.constant dense<0.000000e+00> : vector<16x128xf32>
    %104 = tpu.matmul %102, %103, %cst_53 {dimension_numbers = #tpu.dot_dimension_numbers<[1], [0], [0], [1], [0, 0, 1, 1], [], []>} : vector<16x128xf32>, vector<128x128xf32>, vector<16x128xf32> -> vector<16x128xf32>
    %c0_54 = arith.constant 0 : index
    %c0_55 = arith.constant 0 : index
    %105 = vector.load %arg14[%c0_54, %c0_55] : memref<1x128xf32, #tpu.memory_space<vmem>>, vector<1x128xf32>
    %106 = vector.broadcast %105 : vector<1x128xf32> to vector<16x128xf32>
    %107 = arith.addf %104, %106 : vector<16x128xf32>
    %c0_56 = arith.constant 0 : index
    %c0_57 = arith.constant 0 : index
    %108 = vector.load %arg15[%c0_56, %c0_57] : memref<16x128xf32, #tpu.memory_space<vmem>>, vector<16x128xf32>
    tpu.vector_store %arg15[%c0_56, %c0_57], %107 {strides = array<i32>} : memref<16x128xf32, #tpu.memory_space<vmem>>, vector<16x128xf32>,
    return
  }
}

</mosaic_0001>

<bundles_post_ra>
// kernel: tpu_custom_call.1
= control target key start
LH: loop header
LB: loop body
LE: loop exit
PB: predicated region body
PF: predicated region fallthrough
CT: control target
= control target key end

     0   :  { %20 = vsyncpa [#allocation3], 0  ;;  %s2476_s0 = inlined_call_operand.hbm [shape: f32[16,128], index: 0, kind: input, shape index: {}]   ;;  %s2477_s1 = inlined_call_operand.hbm [shape: f32[128,128], index: 1, kind: input, shape index: {}]   ;;  %s2478_s2 = inlined_call_operand.hbm [shape: f32[128,128], index: 2, kind: input, shape index: {}]   ;;  %s2479_s3 = inlined_call_operand.hbm [shape: f32[128,128], index: 3, kind: input, shape index: {}]   ;;  %s2480_s4 = inlined_call_operand.hbm [shape: f32[128,128], index: 4, kind: input, shape index: {}]   ;;  %s2481_s5 = inlined_call_operand.vmem [shape: f32[1,128], index: 5, kind: input, shape index: {}]   ;;  %s2482_s6 = inlined_call_operand.vmem [shape: f32[1,128], index: 6, kind: input, shape index: {}]   ;;  %s2483_s7 = inlined_call_operand.hbm [shape: f32[128,128], index: 7, kind: input, shape index: {}]   ;;  %s2484_s8 = inlined_call_operand.vmem [shape: f32[1,128], index: 8, kind: input, shape index: {}]   ;;  %s2485_s9 = inlined_call_operand.hbm [shape: f32[128,128], index: 9, kind: input, shape index: {}]   ;;  %s2486_s10 = inlined_call_operand.vmem [shape: f32[1,128], index: 10, kind: input, shape index: {}]   ;;  %s2487_s11 = inlined_call_operand.vmem [shape: f32[1,128], index: 11, kind: input, shape index: {}]   ;;  %s2488_s12 = inlined_call_operand.vmem [shape: f32[1,128], index: 12, kind: input, shape index: {}]   ;;  %s2489_s13 = inlined_call_operand.hbm [shape: f32[128,128], index: 13, kind: input, shape index: {}]   ;;  %s2490_s14 = inlined_call_operand.vmem [shape: f32[1,128], index: 14, kind: input, shape index: {}]   ;;  %s2491_s15 = inlined_call_operand.hbm [shape: f32[16,128], index: 15, kind: output, shape index: {}]  }
   0x1   :  { %21 = vsyncpa [#allocation6], 0 }
   0x2   :  { %22 = vsyncpa [#allocation9], 0 }
   0x3   :  { %23 = vsyncpa [#allocation12], 0 }
   0x4   :  { %24 = vsyncpa [#allocation15], 0 }
   0x5   :  { %25 = vsyncpa [#allocation4], 0  ;;  %s2145_s18 = smov [#allocation5]   ;;  %s2146_s20 = smov [#allocation8]  }
   0x6   :  { %s43_s19 = sshll.u32 %s2145_s18, 4  ;;  %s67_s21 = sshll.u32 %s2146_s20, 4  ;;  %s44_s19 = int_to_ptr.vmem [resolvable:$true] %s43_s19  ;;  %s2238_s21 = int_to_ptr.vmem [resolvable:$true] %s67_s21 }
   0x7   :  { %s1935_s24 = scalar_lea.hbm %s2477_s1, 2048 }
   0x8   :  { %p1936_p0 = scmp.ne.s32.totalorder %s2477_s1, %s1935_s24  ;;  %p1939_p1 = scmp.lt.u32.totalorder %s1935_s24, %s2477_s1 }
   0xa   :  { %p1941_p2 = pnand %p1939_p1, %p1936_p0 }
   0xc   :  { %1944 = shalt.err (!%p1941_p2)
}
   0xd   :  { %s1945_s29 = scalar_lea.vmem %s44_s19, 2048  ;;  %p1950_p4 = scmp.lt.s32.totalorder %s44_s19, %s44_s19 }
   0xe   :  { %p1946_p3 = scmp.ne.s32.totalorder %s44_s19, %s1945_s29  ;;  %p1951_p5 = scmp.lt.s32.totalorder %s1945_s29, %s1945_s29 }
  0x10   :  { %p1952_p6 = por %p1951_p5, %p1950_p4 }
  0x12   :  { %p1953_p7 = pnand %p1952_p6, %p1946_p3 }
  0x14   :  { %1956 = shalt.err (!%p1953_p7)
}
  0x15   :  { %s2147_s30 = smov 128   ;;  %s2148_s16 = smov 8  }
  0x16   :  { %49 = dma.hbm_to_vmem [thread:$0]  %s2477_s1, 2048, %s44_s19, [#allocation6], %s2147_s30, %s2147_s30, %s2148_s16  }
  0x17   :  { %s1957_s23 = scalar_lea.hbm %s2479_s3, 2048 }
  0x18   :  { %p1958_p8 = scmp.ne.s32.totalorder %s2479_s3, %s1957_s23  ;;  %p1961_p9 = scmp.lt.u32.totalorder %s1957_s23, %s2479_s3 }
  0x1a   :  { %p1963_p10 = pnand %p1961_p9, %p1958_p8 }
  0x1c   :  { %1966 = shalt.err (!%p1963_p10)
}
  0x1d   :  { %s1967_s28 = scalar_lea.vmem %s2238_s21, 2048  ;;  %p1972_p12 = scmp.lt.s32.totalorder %s2238_s21, %s2238_s21 }
  0x1e   :  { %p1968_p11 = scmp.ne.s32.totalorder %s2238_s21, %s1967_s28  ;;  %p1973_p13 = scmp.lt.s32.totalorder %s1967_s28, %s1967_s28 }
  0x20   :  { %p1974_p0 = por %p1973_p13, %p1972_p12 }
  0x22   :  { %p1975_p1 = pnand %p1974_p0, %p1968_p11 }
  0x24   :  { %1978 = shalt.err (!%p1975_p1)
}
  0x25   :  { %73 = dma.hbm_to_vmem [thread:$0]  %s2479_s3, 2048, %s2238_s21, [#allocation9], %s2147_s30, %s2147_s30, %s2148_s16  }
  0x26   :  { %s2149_s29 = smov [#allocation11]   ;;  %s2150_s18 = smov [#allocation2]  }
  0x27   :  { %s95_s17 = sshll.u32 %s2149_s29, 4  ;;  %s31_s20 = sshll.u32 %s2150_s18, 4  ;;  %s96_s17 = int_to_ptr.vmem [resolvable:$true] %s95_s17  ;;  %s2275_s20 = int_to_ptr.vmem [resolvable:$true] %s31_s20 }
  0x28   :  { %s1979_s24 = scalar_lea.hbm %s2483_s7, 2048 }
  0x29   :  { %p1980_p2 = scmp.ne.s32.totalorder %s2483_s7, %s1979_s24  ;;  %p1983_p3 = scmp.lt.u32.totalorder %s1979_s24, %s2483_s7 }
  0x2b   :  { %p1985_p4 = pnand %p1983_p3, %p1980_p2 }
  0x2d   :  { %1988 = shalt.err (!%p1985_p4)
}
  0x2e   :  { %s1989_s3 = scalar_lea.vmem %s96_s17, 2048  ;;  %p1994_p6 = scmp.lt.s32.totalorder %s96_s17, %s96_s17 }
  0x2f   :  { %p1990_p5 = scmp.ne.s32.totalorder %s96_s17, %s1989_s3  ;;  %p1995_p7 = scmp.lt.s32.totalorder %s1989_s3, %s1989_s3 }
  0x31   :  { %p1996_p8 = por %p1995_p7, %p1994_p6 }
  0x33   :  { %p1997_p9 = pnand %p1996_p8, %p1990_p5 }
  0x35   :  { %2000 = shalt.err (!%p1997_p9)
}
  0x36   :  { %101 = dma.hbm_to_vmem [thread:$0]  %s2483_s7, 2048, %s96_s17, [#allocation12], %s2147_s30, %s2147_s30, %s2148_s16  }
  0x37   :  { %s2001_s18 = scalar_lea.hbm %s2476_s0, 256 }
  0x38   :  { %p2002_p10 = scmp.ne.s32.totalorder %s2476_s0, %s2001_s18  ;;  %p2005_p11 = scmp.lt.u32.totalorder %s2001_s18, %s2476_s0 }
  0x3a   :  { %p2007_p12 = pnand %p2005_p11, %p2002_p10 }
  0x3c   :  { %2010 = shalt.err (!%p2007_p12)
}
  0x3d   :  { %s2011_s26 = scalar_lea.vmem %s2275_s20, 256  ;;  %p2016_p0 = scmp.lt.s32.totalorder %s2275_s20, %s2275_s20 }
  0x3e   :  { %p2012_p13 = scmp.ne.s32.totalorder %s2275_s20, %s2011_s26  ;;  %p2017_p1 = scmp.lt.s32.totalorder %s2011_s26, %s2011_s26 }
  0x40   :  { %p2018_p2 = por %p2017_p1, %p2016_p0 }
  0x42   :  { %p2019_p3 = pnand %p2018_p2, %p2012_p13 }
  0x44   :  { %2022 = shalt.err (!%p2019_p3)
}
  0x45   :  { %37 = dma.hbm_to_vmem [thread:$0]  %s2476_s0, 256, %s2275_s20, [#allocation3], %s2147_s30, %s2147_s30, %s2148_s16  }
  0x46   :  { %s2151_s27 = smov [#allocation7]   ;;  %s2152_s3 = smov [#allocation10]  }
  0x47   :  { %s55_s28 = sshll.u32 %s2151_s27, 4  ;;  %s79_s21 = sshll.u32 %s2152_s3, 4  ;;  %s56_s28 = int_to_ptr.vmem [resolvable:$true] %s55_s28  ;;  %s2312_s21 = int_to_ptr.vmem [resolvable:$true] %s79_s21 }
  0x48   :  { %s2023_s29 = scalar_lea.hbm %s2478_s2, 2048 }
  0x49   :  { %p2024_p4 = scmp.ne.s32.totalorder %s2478_s2, %s2023_s29  ;;  %p2027_p5 = scmp.lt.u32.totalorder %s2023_s29, %s2478_s2 }
  0x4b   :  { %p2029_p6 = pnand %p2027_p5, %p2024_p4 }
  0x4d   :  { %2032 = shalt.err (!%p2029_p6)
}
  0x4e   :  { %s2033_s0 = scalar_lea.vmem %s56_s28, 2048  ;;  %p2038_p8 = scmp.lt.s32.totalorder %s56_s28, %s56_s28 }
  0x4f   :  { %p2034_p7 = scmp.ne.s32.totalorder %s56_s28, %s2033_s0  ;;  %p2039_p9 = scmp.lt.s32.totalorder %s2033_s0, %s2033_s0 }
  0x51   :  { %p2040_p10 = por %p2039_p9, %p2038_p8 }
  0x53   :  { %p2041_p11 = pnand %p2040_p10, %p2034_p7 }
  0x55   :  { %2044 = shalt.err (!%p2041_p11)
}
  0x56   :  { %61 = dma.hbm_to_vmem [thread:$0]  %s2478_s2, 2048, %s56_s28, [#allocation6], %s2147_s30, %s2147_s30, %s2148_s16  }
  0x57   :  { %s2045_s17 = scalar_lea.hbm %s2480_s4, 2048 }
  0x58   :  { %p2046_p12 = scmp.ne.s32.totalorder %s2480_s4, %s2045_s17  ;;  %p2049_p13 = scmp.lt.u32.totalorder %s2045_s17, %s2480_s4 }
  0x5a   :  { %p2051_p0 = pnand %p2049_p13, %p2046_p12 }
  0x5c   :  { %2054 = shalt.err (!%p2051_p0)
}
  0x5d   :  { %s2055_s29 = scalar_lea.vmem %s2312_s21, 2048  ;;  %p2060_p2 = scmp.lt.s32.totalorder %s2312_s21, %s2312_s21 }
  0x5e   :  { %p2056_p1 = scmp.ne.s32.totalorder %s2312_s21, %s2055_s29  ;;  %p2061_p3 = scmp.lt.s32.totalorder %s2055_s29, %s2055_s29 }
  0x60   :  { %p2062_p4 = por %p2061_p3, %p2060_p2 }
  0x62   :  { %p2063_p5 = pnand %p2062_p4, %p2056_p1 }
  0x64   :  { %2066 = shalt.err (!%p2063_p5)
}
  0x65   :  { %85 = dma.hbm_to_vmem [thread:$0]  %s2480_s4, 2048, %s2312_s21, [#allocation9], %s2147_s30, %s2147_s30, %s2148_s16  }
  0x66   :  { %s2153_s18 = smov [#allocation13]   ;;  %s2154_s23 = smov [#allocation14]  }
  0x67   :  { %s109_s22 = sshll.u32 %s2153_s18, 4  ;;  %s127_s24 = sshll.u32 %s2154_s23, 4  ;;  %s110_s22 = int_to_ptr.vmem [resolvable:$true] %s109_s22  ;;  %s2349_s24 = int_to_ptr.vmem [resolvable:$true] %s127_s24 }
  0x68   :  { %s2067_s25 = scalar_lea.hbm %s2485_s9, 2048 }
  0x69   :  { %p2068_p6 = scmp.ne.s32.totalorder %s2485_s9, %s2067_s25  ;;  %p2071_p7 = scmp.lt.u32.totalorder %s2067_s25, %s2485_s9 }
  0x6b   :  { %p2073_p8 = pnand %p2071_p7, %p2068_p6 }
  0x6d   :  { %2076 = shalt.err (!%p2073_p8)
}
  0x6e   :  { %s2077_s4 = scalar_lea.vmem %s110_s22, 2048  ;;  %p2082_p10 = scmp.lt.s32.totalorder %s110_s22, %s110_s22 }
  0x6f   :  { %p2078_p9 = scmp.ne.s32.totalorder %s110_s22, %s2077_s4  ;;  %p2083_p11 = scmp.lt.s32.totalorder %s2077_s4, %s2077_s4 }
  0x71   :  { %p2084_p12 = por %p2083_p11, %p2082_p10 }
  0x73   :  { %p2085_p13 = pnand %p2084_p12, %p2078_p9 }
  0x75   :  { %2088 = shalt.err (!%p2085_p13)
}
  0x76   :  { %115 = dma.hbm_to_vmem [thread:$0]  %s2485_s9, 2048, %s110_s22, [#allocation12], %s2147_s30, %s2147_s30, %s2148_s16  }
  0x77   :  { %s2089_s29 = scalar_lea.hbm %s2489_s13, 2048 }
  0x78   :  { %p2090_p0 = scmp.ne.s32.totalorder %s2489_s13, %s2089_s29  ;;  %p2093_p1 = scmp.lt.u32.totalorder %s2089_s29, %s2489_s13 }
  0x7a   :  { %p2095_p2 = pnand %p2093_p1, %p2090_p0 }
  0x7c   :  { %2098 = shalt.err (!%p2095_p2)
}
  0x7d   :  { %s2099_s0 = scalar_lea.vmem %s2349_s24, 2048  ;;  %p2104_p4 = scmp.lt.s32.totalorder %s2349_s24, %s2349_s24 }
  0x7e   :  { %p2100_p3 = scmp.ne.s32.totalorder %s2349_s24, %s2099_s0  ;;  %p2105_p5 = scmp.lt.s32.totalorder %s2099_s0, %s2099_s0 }
  0x80   :  { %p2106_p6 = por %p2105_p5, %p2104_p4 }
  0x82   :  { %p2107_p7 = pnand %p2106_p6, %p2100_p3 }
  0x84   :  { %2110 = shalt.err (!%p2107_p7)
}
  0x85   :  { %133 = dma.hbm_to_vmem [thread:$0]  %s2489_s13, 2048, %s2349_s24, [#allocation15], %s2147_s30, %s2147_s30, %s2148_s16  }
  0x86   :  { %2133 = dma.done.wait [#allocation3], 256  }
  0x87   :  { %2134 = vsyncadd [#allocation3], 4294967040 }
  0x88   :  { %2135 = dma.done.wait [#allocation6], 4096  }
  0x89   :  { %2136 = vsyncadd [#allocation6], 4294963200 }
  0x8a   :  { %2137 = dma.done.wait [#allocation9], 4096  }
  0x8b   :  { %2138 = vsyncadd [#allocation9], 4294963200 }
  0x8c   :  { %2139 = dma.done.wait [#allocation12], 4096  }
  0x8d   :  { %2140 = vsyncadd [#allocation12], 4294963200 }
  0x8e   :  { %2141 = dma.done.wait [#allocation15], 2048  }
  0x8f   :  { %2142 = vsyncadd [#allocation15], 4294965248  ;;  %v253_v0 = vld [vmem:[#allocation7] sm:$0xff]  ;;  %v254_v1 = vld [vmem:[#allocation7 + $0x8] sm:$0xff]  ;;  %v2155_v50 = vmov 0.0   ;;  %vm2156_vm0 = vmmov 0  }
  0x90   :  { %v162_v2 = vld [vmem:[#allocation5] sm:$0xff]  ;;  %v1706_v3 = vpack.c.bf16 %v254_v1, %v253_v0  ;;  %v163_v4 = vld [vmem:[#allocation5 + $0x8] sm:$0xff]  ;;  %v255_v5 = vld [vmem:[#allocation7 + $0x10] sm:$0xff]  ;;  %vm577_vm1 = vcmask 64512   ;;  %s2157_s4 = smov [#allocation16]  }
  0x91   :  { %v256_v6 = vld [vmem:[#allocation7 + $0x18] sm:$0xff]  ;;  %v1674_v7 = vpack.c.bf16 %v163_v4, %v162_v2  ;;  %v164_v9 = vld [vmem:[#allocation5 + $0x10] sm:$0xff]  ;;  %v257_v11 = vld [vmem:[#allocation7 + $0x20] sm:$0xff]  ;;  %s1250_s21 = sshll.u32 %s2157_s4, 4  ;;  %s1251_s21 = int_to_ptr.vmem [resolvable:$true] %s1250_s21 }
  0x92   :  { %v1710_v8 = vpack.c.bf16 %v256_v6, %v255_v5  ;;  %v165_v10 = vld [vmem:[#allocation5 + $0x18] sm:$0xff]  ;;  %1707 = vmatprep.subr.bf16.mxu1 %v1706_v3  ;;  %v258_v13 = vld [vmem:[#allocation7 + $0x28] sm:$0xff]  ;;  %v166_v14 = vld [vmem:[#allocation5 + $0x20] sm:$0xff]  ;;  %s2111_s3 = scalar_lea.vmem %s1251_s21, 256  ;;  %p2116_p9 = scmp.lt.s32.totalorder %s1251_s21, %s1251_s21 }
  0x93   :  { %v1678_v12 = vpack.c.bf16 %v165_v10, %v164_v9  ;;  %v167_v15 = vld [vmem:[#allocation5 + $0x28] sm:$0xff]  ;;  %1709 = vmatpush3.bf16.msra.mxu1 %v1706_v3  ;;  %1675 = vmatprep.subr.bf16.mxu0 %v1674_v7  ;;  %v1714_v16 = vpack.c.bf16 %v258_v13, %v257_v11  ;;  %v259_v18 = vld [vmem:[#allocation7 + $0x30] sm:$0xff]  ;;  %v260_v19 = vld [vmem:[#allocation7 + $0x38] sm:$0xff]  ;;  %p2112_p8 = scmp.ne.s32.totalorder %s1251_s21, %s2111_s3  ;;  %p2117_p10 = scmp.lt.s32.totalorder %s2111_s3, %s2111_s3 }
  0x94   :  { %1677 = vmatpush3.bf16.msra.mxu0 %v1674_v7  ;;  %1711 = vmatprep.subr.bf16.mxu1 %v1710_v8  ;;  %v1682_v17 = vpack.c.bf16 %v167_v15, %v166_v14  ;;  %v168_v20 = vld [vmem:[#allocation5 + $0x30] sm:$0xff]  ;;  %v169_v21 = vld [vmem:[#allocation5 + $0x38] sm:$0xff]  ;;  %v1718_v22 = vpack.c.bf16 %v260_v19, %v259_v18  ;;  %v261_v24 = vld [vmem:[#allocation7 + $0x40] sm:$0xff] }
  0x95   :  { %1679 = vmatprep.subr.bf16.mxu0 %v1678_v12  ;;  %v1686_v23 = vpack.c.bf16 %v169_v21, %v168_v20  ;;  %v262_v25 = vld [vmem:[#allocation7 + $0x48] sm:$0xff]  ;;  %v2386_v26 = vld [vmem:[#allocation2] sm:$0xff]  ;;  %v170_v27 = vld [vmem:[#allocation5 + $0x40] sm:$0xff]  ;;  %p2118_p11 = por %p2117_p10, %p2116_p9 }
  0x96   :  { %v171_v28 = vld [vmem:[#allocation5 + $0x48] sm:$0xff]  ;;  %1476 = vmatprep.mubr.f32.mxu1 %v2386_v26  ;;  %1441 = vmatprep.mubr.f32.mxu0 %v2386_v26  ;;  %v1722_v29 = vpack.c.bf16 %v262_v25, %v261_v24  ;;  %v263_v31 = vld [vmem:[#allocation7 + $0x50] sm:$0xff]  ;;  %v264_v32 = vld [vmem:[#allocation7 + $0x58] sm:$0xff] }
  0x97   :  { %1713 = vmatpush3.bf16.msra.mxu1 %v1710_v8  ;;  %v1690_v30 = vpack.c.bf16 %v171_v28, %v170_v27  ;;  %v172_v33 = vld [vmem:[#allocation5 + $0x50] sm:$0xff]  ;;  %v173_v34 = vld [vmem:[#allocation5 + $0x58] sm:$0xff]  ;;  %v1726_v35 = vpack.c.bf16 %v264_v32, %v263_v31  ;;  %v265_v37 = vld [vmem:[#allocation7 + $0x60] sm:$0xff]  ;;  %p2119_p12 = pnand %p2118_p11, %p2112_p8 }
  0x98   :  { %1681 = vmatpush3.bf16.msra.mxu0 %v1678_v12  ;;  %1715 = vmatprep.subr.bf16.mxu1 %v1714_v16  ;;  %v1694_v36 = vpack.c.bf16 %v173_v34, %v172_v33  ;;  %v266_v38 = vld [vmem:[#allocation7 + $0x68] sm:$0xff]  ;;  %v174_v39 = vld [vmem:[#allocation5 + $0x60] sm:$0xff]  ;;  %v267_v43 = vld [vmem:[#allocation7 + $0x70] sm:$0xff] }
  0x99   :  { %1683 = vmatprep.subr.bf16.mxu0 %v1682_v17  ;;  %v175_v40 = vld [vmem:[#allocation5 + $0x68] sm:$0xff]  ;;  %v1730_v41 = vpack.c.bf16 %v266_v38, %v265_v37  ;;  %v268_v44 = vld [vmem:[#allocation7 + $0x78] sm:$0xff]  ;;  %v176_v45 = vld [vmem:[#allocation5 + $0x70] sm:$0xff] }
  0x9a   :  { %v1698_v42 = vpack.c.bf16 %v175_v40, %v174_v39  ;;  %v177_v46 = vld [vmem:[#allocation5 + $0x78] sm:$0xff]  ;;  %v1734_v47 = vpack.c.bf16 %v268_v44, %v267_v43  ;;  %v344_v55 = vld [vmem:[#allocation8] sm:$0xff]  ;;  %v345_v56 = vld [vmem:[#allocation8 + $0x8] sm:$0xff] }
  0x9b   :  { %1717 = vmatpush3.bf16.msra.mxu1 %v1714_v16  ;;  %v1702_v48 = vpack.c.bf16 %v177_v46, %v176_v45  ;;  %v2390_v49 = vld [vmem:[#allocation2 + $0x8] sm:$0xff]  ;;  %v346_v57 = vld [vmem:[#allocation8 + $0x10] sm:$0xff]  ;;  %v1738_v58 = vpack.c.bf16 %v345_v56, %v344_v55  ;;  %v348_v61 = vld [vmem:[#allocation8 + $0x20] sm:$0xff] }
  0x9c   :  { %1685 = vmatpush3.bf16.msra.mxu0 %v1682_v17  ;;  %1719 = vmatprep.subr.bf16.mxu1 %v1718_v22  ;;  %v347_v59 = vld [vmem:[#allocation8 + $0x18] sm:$0xff]  ;;  %v349_v62 = vld [vmem:[#allocation8 + $0x28] sm:$0xff]  ;;  %v350_v0 = vld [vmem:[#allocation8 + $0x30] sm:$0xff] }
  0x9d   :  { %1687 = vmatprep.subr.bf16.mxu0 %v1686_v23  ;;  %v1742_v60 = vpack.c.bf16 %v347_v59, %v346_v57  ;;  %v1746_v63 = vpack.c.bf16 %v349_v62, %v348_v61  ;;  %v351_v1 = vld [vmem:[#allocation8 + $0x38] sm:$0xff]  ;;  %v352_v3 = vld [vmem:[#allocation8 + $0x40] sm:$0xff]  ;;  %v353_v4 = vld [vmem:[#allocation8 + $0x48] sm:$0xff] }
  0x9e   :  { %v1750_v2 = vpack.c.bf16 %v351_v1, %v350_v0  ;;  %v1754_v5 = vpack.c.bf16 %v353_v4, %v352_v3  ;;  %v354_v6 = vld [vmem:[#allocation8 + $0x50] sm:$0xff]  ;;  %v355_v7 = vld [vmem:[#allocation8 + $0x58] sm:$0xff]  ;;  %v356_v9 = vld [vmem:[#allocation8 + $0x60] sm:$0xff] }
  0x9f   :  { %1721 = vmatpush3.bf16.msra.mxu1 %v1718_v22  ;;  %v1758_v8 = vpack.c.bf16 %v355_v7, %v354_v6  ;;  %v357_v10 = vld [vmem:[#allocation8 + $0x68] sm:$0xff]  ;;  %v358_v12 = vld [vmem:[#allocation8 + $0x70] sm:$0xff]  ;;  %v359_v13 = vld [vmem:[#allocation8 + $0x78] sm:$0xff] }
  0xa0   :  { %1689 = vmatpush3.bf16.msra.mxu0 %v1686_v23  ;;  %1723 = vmatprep.subr.bf16.mxu1 %v1722_v29  ;;  %v1762_v11 = vpack.c.bf16 %v357_v10, %v356_v9  ;;  %v1766_v14 = vpack.c.bf16 %v359_v13, %v358_v12  ;;  %v746_v38 = vld [vmem:[#allocation10] sm:$0xff]  ;;  %v747_v39 = vld [vmem:[#allocation10 + $0x8] sm:$0xff]  ;;  %v748_v43 = vld [vmem:[#allocation10 + $0x10] sm:$0xff] }
  0xa1   :  { %1691 = vmatprep.subr.bf16.mxu0 %v1690_v30  ;;  %v749_v44 = vld [vmem:[#allocation10 + $0x18] sm:$0xff]  ;;  %v754_v56 = vld [vmem:[#allocation10 + $0x40] sm:$0xff]  ;;  %v755_v57 = vld [vmem:[#allocation10 + $0x48] sm:$0xff] }
  0xa2   :  { %v757_v59 = vld [vmem:[#allocation10 + $0x58] sm:$0xff]  ;;  %v758_v61 = vld [vmem:[#allocation10 + $0x60] sm:$0xff]  ;;  %v759_v62 = vld [vmem:[#allocation10 + $0x68] sm:$0xff] }
  0xa3   :  { %1725 = vmatpush3.bf16.msra.mxu1 %v1722_v29  ;;  %v760_v0 = vld [vmem:[#allocation10 + $0x70] sm:$0xff]  ;;  %v761_v1 = vld [vmem:[#allocation10 + $0x78] sm:$0xff]  ;;  %v883_v7 = vld [vmem:[#allocation11] sm:$0xff] }
  0xa4   :  { %1693 = vmatpush3.bf16.msra.mxu0 %v1690_v30  ;;  %1727 = vmatprep.subr.bf16.mxu1 %v1726_v35 }
  0xa5   :  { %1695 = vmatprep.subr.bf16.mxu0 %v1694_v36 }
  0xa7   :  { %1729 = vmatpush3.bf16.msra.mxu1 %v1726_v35 }
  0xa8   :  { %1697 = vmatpush3.bf16.msra.mxu0 %v1694_v36  ;;  %1731 = vmatprep.subr.bf16.mxu1 %v1730_v41 }
  0xa9   :  { %1699 = vmatprep.subr.bf16.mxu0 %v1698_v42 }
  0xab   :  { %1733 = vmatpush3.bf16.msra.mxu1 %v1730_v41 }
  0xac   :  { %1701 = vmatpush3.bf16.msra.mxu0 %v1698_v42  ;;  %1735 = vmatprep.subr.bf16.mxu1 %v1734_v47  ;;  %v1770_v42 = vpack.c.bf16 %v747_v39, %v746_v38  ;;  %v993_v38 = vld [vmem:[#allocation13 + $0x10] sm:$0xff] }
  0xad   :  { %1703 = vmatprep.subr.bf16.mxu0 %v1702_v48 }
  0xaf   :  { %1737 = vmatpush3.bf16.msra.mxu1 %v1734_v47  ;;  %v1774_v47 = vpack.c.bf16 %v749_v44, %v748_v43  ;;  %v996_v43 = vld [vmem:[#allocation13 + $0x28] sm:$0xff] }
  0xb0   :  { %1705 = vmatpush3.bf16.msra.mxu0 %v1702_v48  ;;  %1514 = vmatprep.subr.mxu1 %v2155_v50  ;;  %v750_v48 = vld [vmem:[#allocation10 + $0x20] sm:$0xff] }
  0xb1   :  { %1739 = vmatprep.subr.bf16.mxu0 %v1738_v58 }
  0xb2   :  { %1477 = vmatmul.mubr.f32.vlgmr.msra.gmra.mrb[0].mxu1 %v2390_v49 }
  0xb3   :  { %1442 = vmatmul.mubr.f32.vlgmr.msra.gmra.mrb[0].mxu0 %v2390_v49  ;;  %1516 = vmatprep.mubr.msk.f32.mxu1 %vm2156_vm0, %v2155_v50 }
  0xb4   :  { %1511 = vmatprep.mubr.f32.mxu0 %v2386_v26  ;;  %1741 = vmatpush3.bf16.msra.mxu0 %v1738_v58  ;;  %v756_v58 = vld [vmem:[#allocation10 + $0x50] sm:$0xff] }
  0xb5   :  { %1743 = vmatprep.subr.bf16.mxu0 %v1742_v60 }
  0xb8   :  { %1745 = vmatpush3.bf16.msra.mxu0 %v1742_v60  ;;  %v1790_v60 = vpack.c.bf16 %v757_v59, %v756_v58 }
  0xb9   :  { %1747 = vmatprep.subr.bf16.mxu0 %v1746_v63 }
  0xbc   :  { %1749 = vmatpush3.bf16.msra.mxu0 %v1746_v63  ;;  %v1794_v63 = vpack.c.bf16 %v759_v62, %v758_v61 }
  0xbd   :  { %1751 = vmatprep.subr.bf16.mxu0 %v1750_v2 }
  0xc0   :  { %1753 = vmatpush3.bf16.msra.mxu0 %v1750_v2  ;;  %v1798_v2 = vpack.c.bf16 %v761_v1, %v760_v0 }
  0xc1   :  { %1755 = vmatprep.subr.bf16.mxu0 %v1754_v5 }
  0xc4   :  { %1757 = vmatpush3.bf16.msra.mxu0 %v1754_v5 }
  0xc5   :  { %1759 = vmatprep.subr.bf16.mxu0 %v1758_v8 }
  0xc8   :  { %1761 = vmatpush3.bf16.msra.mxu0 %v1758_v8  ;;  %v884_v8 = vld [vmem:[#allocation11 + $0x8] sm:$0xff] }
  0xc9   :  { %1763 = vmatprep.subr.bf16.mxu0 %v1762_v11  ;;  %v1802_v9 = vpack.c.bf16 %v884_v8, %v883_v7  ;;  %v997_v8 = vld [vmem:[#allocation13 + $0x30] sm:$0xff] }
  0xcc   :  { %1765 = vmatpush3.bf16.msra.mxu0 %v1762_v11 }
  0xcd   :  { %1767 = vmatprep.subr.bf16.mxu0 %v1766_v14 }
  0xd0   :  { %1769 = vmatpush3.bf16.msra.mxu0 %v1766_v14 }
  0xd1   :  { %1803 = vmatprep.subr.bf16.mxu0 %v1802_v9 }
  0xd3   :  { %1512 = vmatmul.mubr.f32.vlgmr.msra.gmra.mrb[2].mxu0 %v2390_v49 }
  0xd4   :  { %1805 = vmatpush3.bf16.msra.mxu0 %v1802_v9  ;;  %v998_v9 = vld [vmem:[#allocation13 + $0x38] sm:$0xff] }
 0x185   :  { %v1478_v51 = vpop.f32.mrb[0].mxu1 }
 0x186   :  { %v335_v52 = vpop.f32.mrb[1].mxu1  ;;  %v1443_v53 = vpop.f32.mrb[0].mxu0 }
 0x187   :  { %1515 = vmatpush3.xpose.msra.mxu1 %v335_v52  ;;  %v244_v54 = vpop.f32.mrb[1].mxu0 }
 0x188   :  { %1519 = vmatprep.subr.mxu1 %v2155_v50 }
 0x18a   :  { %1517 = vmatmul.mubr.f32.vlgmr.msra.gmra.mrb[2].mxu1 %v244_v54  ;;  %v753_v54 = vld [vmem:[#allocation10 + $0x38] sm:$0xff] }
 0x18b   :  { %1520 = vmatpush3.xpose.msra.mxu1 %v1478_v51  ;;  %1521 = vmatprep.mubr.msk.f32.mxu1 %vm2156_vm0, %v2155_v50  ;;  %v751_v51 = vld [vmem:[#allocation10 + $0x28] sm:$0xff] }
 0x18c   :  { %1524 = vmatprep.subr.mxu1 %v2155_v50  ;;  %v1778_v52 = vpack.c.bf16 %v751_v51, %v750_v48 }
 0x18e   :  { %1522 = vmatmul.mubr.f32.vlgmr.msra.gmra.mrb[4].mxu1 %v1443_v53  ;;  %v752_v53 = vld [vmem:[#allocation10 + $0x30] sm:$0xff] }
 0x18f   :  { %1526 = vmatprep.mubr.msk.f32.mxu1 %vm2156_vm0, %v2155_v50  ;;  %v1782_v55 = vpack.c.bf16 %v753_v54, %v752_v53 }
 0x1a6   :  { %v1513_v34 = vpop.f32.mrb[2].mxu0 }
 0x1a7   :  { %v426_v35 = vpop.f32.mrb[3].mxu0 }
 0x1a8   :  { %1525 = vmatpush3.msra.mxu1 %v426_v35 }
 0x1a9   :  { %1529 = vmatprep.subr.mxu1 %v2155_v50 }
 0x25d   :  { %v501_v15 = vpop.f32.mrb[2].mxu1 }
 0x25e   :  { %v575_v16 = vmul.f32 0.17677669, %v501_v15  ;;  %v1518_v17 = vpop.f32.mrb[3].mxu1 }
 0x25f   :  { %v886_v17 = vld [vmem:[#allocation11 + $0x18] sm:$0xff] }
 0x260   :  { %v578_v18 = vsel %vm577_vm1, %v575_v16, -inf }
 0x261   :  { %579 = vmax.xlane.f32.xlu0 %v578_v18  ;;  %v571_v19 = vpop.f32.mrb[4].mxu1  ;;  %v887_v18 = vld [vmem:[#allocation11 + $0x20] sm:$0xff] }
 0x262   :  { %v576_v20 = vmul.f32 0.17677669, %v571_v19  ;;  %v1523_v21 = vpop.f32.mrb[5].mxu1 }
 0x263   :  { %v890_v21 = vld [vmem:[#allocation11 + $0x38] sm:$0xff] }
 0x264   :  { %v581_v22 = vsel %vm577_vm1, %v576_v20, -inf }
 0x265   :  { %582 = vmax.xlane.f32.xlu0 %v581_v22 }
 0x2ee   :  { %v580_v23 = vpop.xlane.xlu0 %579 }
 0x2ef   :  { %v584_v24 = vsub.f32 %v575_v16, %v580_v23  ;;  %v885_v16 = vld [vmem:[#allocation11 + $0x10] sm:$0xff]  ;;  %v891_v23 = vld [vmem:[#allocation11 + $0x40] sm:$0xff] }
 0x2f1   :  { %v586_v25 = vmul.f32 1.442695, %v584_v24  ;;  %v892_v24 = vld [vmem:[#allocation11 + $0x48] sm:$0xff] }
 0x2f2   :  { %v583_v27 = vpop.xlane.xlu0 %582 }
 0x2f3   :  { %1911 = vpow2.f32 %v586_v25  ;;  %v585_v28 = vsub.f32 %v576_v20, %v583_v27  ;;  %v889_v20 = vld [vmem:[#allocation11 + $0x30] sm:$0xff]  ;;  %v1818_v27 = vpack.c.bf16 %v892_v24, %v891_v23 }
 0x2f4   :  { %v1814_v22 = vpack.c.bf16 %v890_v21, %v889_v20  ;;  %v893_v25 = vld [vmem:[#allocation11 + $0x50] sm:$0xff] }
 0x2f5   :  { %v588_v29 = vmul.f32 1.442695, %v585_v28  ;;  %v894_v28 = vld [vmem:[#allocation11 + $0x58] sm:$0xff]  ;;  %v1270_v21 = vld [vmem:[%s2484_s8] ss:$0 sm:$0xff] }
 0x2f7   :  { %1913 = vpow2.f32 %v588_v29  ;;  %v1822_v29 = vpack.c.bf16 %v894_v28, %v893_v25 }
 0x2fd   :  { %v1912_v30 = vpop.eup %1911 }
 0x2fe   :  { %v590_v31 = vsel %vm577_vm1, %v1912_v30, 0.0 }
 0x2ff   :  { %591 = vadd.xlane.f32.xlu1 %v590_v31  ;;  %v896_v31 = vld [vmem:[#allocation11 + $0x68] sm:$0xff] }
 0x301   :  { %v1914_v32 = vpop.eup %1913 }
 0x302   :  { %v593_v33 = vsel %vm577_vm1, %v1914_v32, 0.0 }
 0x303   :  { %594 = vadd.xlane.f32.xlu1 %v593_v33  ;;  %v897_v33 = vld [vmem:[#allocation11 + $0x70] sm:$0xff] }
 0x38c   :  { %v592_v36 = vpop.xlane.xlu1 %591 }
 0x38d   :  { %1915 = vrcp.f32 %v592_v36  ;;  %v991_v36 = vld [vmem:[#allocation13] sm:$0xff] }
 0x390   :  { %v595_v37 = vpop.xlane.xlu1 %594 }
 0x391   :  { %1917 = vrcp.f32 %v595_v37  ;;  %v992_v37 = vld [vmem:[#allocation13 + $0x8] sm:$0xff] }
 0x392   :  { %v1834_v39 = vpack.c.bf16 %v992_v37, %v991_v36  ;;  %v1271_v37 = vld [vmem:[%s2486_s10] ss:$0 sm:$0xff] }
 0x397   :  { %v1916_v40 = vpop.eup %1915 }
 0x398   :  { %v598_v41 = vmul.f32 %v1916_v40, %v1912_v30  ;;  %v895_v30 = vld [vmem:[#allocation11 + $0x60] sm:$0xff]  ;;  %v994_v40 = vld [vmem:[#allocation13 + $0x18] sm:$0xff] }
 0x39a   :  { %1527 = vmatmul.mubr.msk.f32.vlgmr.msra.gmra.mrb[6].mxu1 %vm577_vm1, %v598_v41  ;;  %v1838_v41 = vpack.c.bf16 %v994_v40, %v993_v38 }
 0x39b   :  { %v1918_v45 = vpop.eup %1917  ;;  %1530 = vmatpush3.msra.mxu1 %v1513_v34  ;;  %1531 = vmatprep.mubr.msk.f32.mxu1 %vm2156_vm0, %v2155_v50  ;;  %v1786_v50 = vpack.c.bf16 %v755_v57, %v754_v56  ;;  %v898_v34 = vld [vmem:[#allocation11 + $0x78] sm:$0xff] }
 0x39c   :  { %v599_v46 = vmul.f32 %v1918_v45, %v1914_v32  ;;  %1771 = vmatprep.subr.bf16.mxu1 %v1770_v42  ;;  %v1826_v32 = vpack.c.bf16 %v896_v31, %v895_v30  ;;  %v1830_v35 = vpack.c.bf16 %v898_v34, %v897_v33 }
 0x39e   :  { %1532 = vmatmul.mubr.msk.f32.vlgmr.msra.gmra.mrb[8].mxu1 %vm577_vm1, %v599_v46 }
 0x39f   :  { %1773 = vmatpush3.bf16.msra.mxu1 %v1770_v42  ;;  %v995_v42 = vld [vmem:[#allocation13 + $0x20] sm:$0xff] }
 0x3a0   :  { %1775 = vmatprep.subr.bf16.mxu1 %v1774_v47  ;;  %v1842_v44 = vpack.c.bf16 %v996_v43, %v995_v42 }
 0x3a3   :  { %1777 = vmatpush3.bf16.msra.mxu1 %v1774_v47 }
 0x3a4   :  { %1779 = vmatprep.subr.bf16.mxu1 %v1778_v52 }
 0x3a7   :  { %1781 = vmatpush3.bf16.msra.mxu1 %v1778_v52 }
 0x3a8   :  { %1783 = vmatprep.subr.bf16.mxu1 %v1782_v55 }
 0x3ab   :  { %1785 = vmatpush3.bf16.msra.mxu1 %v1782_v55 }
 0x3ac   :  { %1787 = vmatprep.subr.bf16.mxu1 %v1786_v50 }
 0x3af   :  { %1789 = vmatpush3.bf16.msra.mxu1 %v1786_v50 }
 0x3b0   :  { %1791 = vmatprep.subr.bf16.mxu1 %v1790_v60 }
 0x3b3   :  { %1793 = vmatpush3.bf16.msra.mxu1 %v1790_v60 }
 0x3b4   :  { %1795 = vmatprep.subr.bf16.mxu1 %v1794_v63 }
 0x3b7   :  { %1797 = vmatpush3.bf16.msra.mxu1 %v1794_v63  ;;  %v1268_v63 = vld [vmem:[%s2481_s5] ss:$0 sm:$0xff] }
 0x3b8   :  { %1799 = vmatprep.subr.bf16.mxu1 %v1798_v2 }
 0x3bb   :  { %1801 = vmatpush3.bf16.msra.mxu1 %v1798_v2 }
 0x3bc   :  { %1835 = vmatprep.subr.bf16.mxu1 %v1834_v39 }
 0x46d   :  { %v669_v3 = vpop.f32.mrb[6].mxu1 }
 0x46e   :  { %v1528_v4 = vpop.f32.mrb[7].mxu1  ;;  %1566 = vmatprep.mubr.f32.mxu1 %v669_v3  ;;  %v1269_v3 = vld [vmem:[%s2482_s6] ss:$0 sm:$0xff] }
 0x471   :  { %v742_v5 = vpop.f32.mrb[8].mxu1 }
 0x472   :  { %v1533_v6 = vpop.f32.mrb[9].mxu1  ;;  %1567 = vmatmul.mubr.f32.vlgmr.msra.gmra.mrb[10].mxu1 %v742_v5 }
 0x473   :  { %1837 = vmatpush3.bf16.msra.mxu1 %v1834_v39 }
 0x474   :  { %1839 = vmatprep.subr.bf16.mxu1 %v1838_v41 }
 0x477   :  { %1841 = vmatpush3.bf16.msra.mxu1 %v1838_v41 }
 0x478   :  { %1843 = vmatprep.subr.bf16.mxu1 %v1842_v44 }
 0x47b   :  { %1845 = vmatpush3.bf16.msra.mxu1 %v1842_v44 }
 0x545   :  { %v1568_v10 = vpop.f32.mrb[10].mxu1 }
 0x546   :  { %v2415_v11 = vadd.f32 %v1568_v10, %v2390_v49  ;;  %v828_v12 = vpop.f32.mrb[11].mxu1  ;;  %v1806_v49 = vpack.c.bf16 %v886_v17, %v885_v16  ;;  %v1846_v10 = vpack.c.bf16 %v998_v9, %v997_v8  ;;  %v1003_v17 = vld [vmem:[#allocation13 + $0x60] sm:$0xff] }
 0x547   :  { %v2418_v13 = vadd.f32 %v828_v12, %v2386_v26  ;;  %v888_v26 = vld [vmem:[#allocation11 + $0x28] sm:$0xff] }
 0x548   :  { %843 = vadd.xlane.f32.xlu1 %v2415_v11  ;;  %v848_v14 = vmul.f32 %v2415_v11, %v2415_v11  ;;  %1807 = vmatprep.subr.bf16.mxu0 %v1806_v49  ;;  %v1810_v19 = vpack.c.bf16 %v888_v26, %v887_v18  ;;  %v1000_v12 = vld [vmem:[#allocation13 + $0x48] sm:$0xff]  ;;  %v1005_v26 = vld [vmem:[#allocation13 + $0x70] sm:$0xff] }
 0x549   :  { %841 = vadd.xlane.f32.xlu0 %v2418_v13  ;;  %v847_v15 = vmul.f32 %v2418_v13, %v2418_v13  ;;  %1809 = vmatpush3.bf16.msra.mxu0 %v1806_v49  ;;  %v1004_v49 = vld [vmem:[#allocation13 + $0x68] sm:$0xff] }
 0x54a   :  { %1811 = vmatprep.subr.bf16.mxu0 %v1810_v19  ;;  %1847 = vmatprep.subr.bf16.mxu1 %v1846_v10  ;;  %v1858_v18 = vpack.c.bf16 %v1004_v49, %v1003_v17 }
 0x54b   :  { %1849 = vmatpush3.bf16.msra.mxu1 %v1846_v10 }
 0x54c   :  { %851 = vadd.xlane.f32.xlu1 %v848_v14  ;;  %v1001_v14 = vld [vmem:[#allocation13 + $0x50] sm:$0xff] }
 0x54d   :  { %849 = vadd.xlane.f32.xlu0 %v847_v15  ;;  %1813 = vmatpush3.bf16.msra.mxu0 %v1810_v19  ;;  %v1002_v15 = vld [vmem:[#allocation13 + $0x58] sm:$0xff] }
 0x54e   :  { %1815 = vmatprep.subr.bf16.mxu0 %v1814_v22  ;;  %v1854_v16 = vpack.c.bf16 %v1002_v15, %v1001_v14  ;;  %v1006_v19 = vld [vmem:[#allocation13 + $0x78] sm:$0xff] }
 0x54f   :  { %v1862_v20 = vpack.c.bf16 %v1006_v19, %v1005_v26 }
 0x551   :  { %1817 = vmatpush3.bf16.msra.mxu0 %v1814_v22 }
 0x552   :  { %1819 = vmatprep.subr.bf16.mxu0 %v1818_v27 }
 0x555   :  { %1821 = vmatpush3.bf16.msra.mxu0 %v1818_v27 }
 0x556   :  { %1823 = vmatprep.subr.bf16.mxu0 %v1822_v29 }
 0x559   :  { %1825 = vmatpush3.bf16.msra.mxu0 %v1822_v29 }
 0x55a   :  { %1827 = vmatprep.subr.bf16.mxu0 %v1826_v32 }
 0x55d   :  { %1829 = vmatpush3.bf16.msra.mxu0 %v1826_v32 }
 0x55e   :  { %1831 = vmatprep.subr.bf16.mxu0 %v1830_v35 }
 0x561   :  { %1833 = vmatpush3.bf16.msra.mxu0 %v1830_v35 }
 0x5d5   :  { %v844_v45 = vpop.xlane.xlu1 %843 }
 0x5d6   :  { %v846_v46 = vmul.f32 0.03125, %v844_v45  ;;  %v842_v47 = vpop.xlane.xlu0 %841 }
 0x5d7   :  { %v845_v48 = vmul.f32 0.03125, %v842_v47  ;;  %v1146_v47 = vld [vmem:[#allocation14 + $0x8] sm:$0xff] }
 0x5d8   :  { %v856_v52 = vmul.f32 %v846_v46, %v846_v46  ;;  %v860_v60 = vsub.f32 %v2415_v11, %v846_v46  ;;  %v999_v11 = vld [vmem:[#allocation13 + $0x40] sm:$0xff] }
 0x5d9   :  { %v852_v51 = vpop.xlane.xlu1 %851  ;;  %v855_v55 = vmul.f32 %v845_v48, %v845_v48  ;;  %v859_v62 = vsub.f32 %v2418_v13, %v845_v48  ;;  %v1850_v13 = vpack.c.bf16 %v1000_v12, %v999_v11  ;;  %v1145_v46 = vld [vmem:[#allocation14] sm:$0xff] }
 0x5da   :  { %v854_v53 = vmul.f32 0.03125, %v852_v51  ;;  %v850_v54 = vpop.xlane.xlu0 %849  ;;  %v1866_v48 = vpack.c.bf16 %v1146_v47, %v1145_v46  ;;  %v1147_v51 = vld [vmem:[#allocation14 + $0x10] sm:$0xff] }
 0x5db   :  { %v853_v56 = vmul.f32 0.03125, %v850_v54  ;;  %1851 = vmatprep.subr.bf16.mxu1 %v1850_v13  ;;  %v1149_v54 = vld [vmem:[#allocation14 + $0x20] sm:$0xff] }
 0x5dc   :  { %v858_v57 = vsub.f32 %v854_v53, %v856_v52  ;;  %1853 = vmatpush3.bf16.msra.mxu1 %v1850_v13  ;;  %1867 = vmatprep.subr.bf16.mxu0 %v1866_v48  ;;  %v1148_v52 = vld [vmem:[#allocation14 + $0x18] sm:$0xff] }
 0x5dd   :  { %v857_v50 = vsub.f32 %v853_v56, %v855_v55  ;;  %1855 = vmatprep.subr.bf16.mxu1 %v1854_v16  ;;  %v1870_v53 = vpack.c.bf16 %v1148_v52, %v1147_v51  ;;  %v1150_v55 = vld [vmem:[#allocation14 + $0x28] sm:$0xff] }
 0x5de   :  { %v862_v58 = vadd.f32 1e-12, %v858_v57  ;;  %v1874_v56 = vpack.c.bf16 %v1150_v55, %v1149_v54  ;;  %v1151_v57 = vld [vmem:[#allocation14 + $0x30] sm:$0xff] }
 0x5df   :  { %v861_v59 = vadd.f32 1e-12, %v857_v50  ;;  %v1152_v50 = vld [vmem:[#allocation14 + $0x38] sm:$0xff] }
 0x5e0   :  { %1919 = vrsqrt.f32 %v862_v58  ;;  %1857 = vmatpush3.bf16.msra.mxu1 %v1854_v16  ;;  %v1878_v58 = vpack.c.bf16 %v1152_v50, %v1151_v57 }
 0x5e1   :  { %1921 = vrsqrt.f32 %v861_v59  ;;  %1859 = vmatprep.subr.bf16.mxu1 %v1858_v18  ;;  %v1153_v59 = vld [vmem:[#allocation14 + $0x40] sm:$0xff] }
 0x5e4   :  { %1861 = vmatpush3.bf16.msra.mxu1 %v1858_v18 }
 0x5e5   :  { %1863 = vmatprep.subr.bf16.mxu1 %v1862_v20 }
 0x5e8   :  { %1865 = vmatpush3.bf16.msra.mxu1 %v1862_v20 }
 0x5ea   :  { %v1920_v61 = vpop.eup %1919 }
 0x5eb   :  { %v1922_v0 = vpop.eup %1921  ;;  %v866_v1 = vmul.f32 %v1920_v61, %v860_v60  ;;  %v1154_v60 = vld [vmem:[#allocation14 + $0x48] sm:$0xff] }
 0x5ec   :  { %v865_v2 = vmul.f32 %v1922_v0, %v859_v62  ;;  %v1882_v61 = vpack.c.bf16 %v1154_v60, %v1153_v59  ;;  %v1155_v62 = vld [vmem:[#allocation14 + $0x50] sm:$0xff] }
 0x5ed   :  { %v874_v4 = vmul.f32 %v1268_v63, %v866_v1  ;;  %v1157_v1 = vld [vmem:[#allocation14 + $0x60] sm:$0xff] }
 0x5ee   :  { %v873_v5 = vmul.f32 %v1268_v63, %v865_v2  ;;  %v1156_v63 = vld [vmem:[#allocation14 + $0x58] sm:$0xff]  ;;  %v1158_v2 = vld [vmem:[#allocation14 + $0x68] sm:$0xff] }
 0x5ef   :  { %v882_v7 = vadd.f32 %v1269_v3, %v874_v4  ;;  %v1886_v0 = vpack.c.bf16 %v1156_v63, %v1155_v62  ;;  %v1159_v4 = vld [vmem:[#allocation14 + $0x70] sm:$0xff] }
 0x5f0   :  { %v881_v6 = vadd.f32 %v1269_v3, %v873_v5  ;;  %v1890_v3 = vpack.c.bf16 %v1158_v2, %v1157_v1  ;;  %v1160_v5 = vld [vmem:[#allocation14 + $0x78] sm:$0xff] }
 0x5f2   :  { %1601 = vmatprep.mubr.f32.mxu0 %v881_v6 }
 0x5f3   :  { %1602 = vmatmul.mubr.f32.vlgmr.msra.gmra.mrb[4].mxu0 %v882_v7 }
 0x5f4   :  { %1869 = vmatpush3.bf16.msra.mxu0 %v1866_v48 }
 0x5f5   :  { %1871 = vmatprep.subr.bf16.mxu0 %v1870_v53 }
 0x5f8   :  { %1873 = vmatpush3.bf16.msra.mxu0 %v1870_v53 }
 0x5f9   :  { %1875 = vmatprep.subr.bf16.mxu0 %v1874_v56 }
 0x5fc   :  { %1877 = vmatpush3.bf16.msra.mxu0 %v1874_v56 }
 0x5fd   :  { %1879 = vmatprep.subr.bf16.mxu0 %v1878_v58 }
 0x600   :  { %1881 = vmatpush3.bf16.msra.mxu0 %v1878_v58 }
 0x601   :  { %1883 = vmatprep.subr.bf16.mxu0 %v1882_v61 }
 0x604   :  { %1885 = vmatpush3.bf16.msra.mxu0 %v1882_v61 }
 0x605   :  { %1887 = vmatprep.subr.bf16.mxu0 %v1886_v0 }
 0x608   :  { %1889 = vmatpush3.bf16.msra.mxu0 %v1886_v0 }
 0x609   :  { %1891 = vmatprep.subr.bf16.mxu0 %v1890_v3 }
 0x60c   :  { %1893 = vmatpush3.bf16.msra.mxu0 %v1890_v3 }
 0x6c6   :  { %v1603_v22 = vpop.f32.mrb[4].mxu0 }
 0x6c7   :  { %v978_v23 = vadd.f32 %v1603_v22, %v1270_v21  ;;  %v972_v24 = vpop.f32.mrb[5].mxu0  ;;  %v1272_v22 = vld [vmem:[%s2487_s11] ss:$0 sm:$0xff] }
 0x6c8   :  { %v973_v25 = vadd.f32 %v1270_v21, %v972_v24 }
 0x6c9   :  { %v984_v27 = vmul.f32 0.70710677, %v978_v23  ;;  %v982_v34 = vmul.f32 0.5, %v978_v23 }
 0x6ca   :  { %v983_v28 = vmul.f32 0.70710677, %v973_v25  ;;  %v981_v32 = vmul.f32 0.5, %v973_v25  ;;  %v1273_v25 = vld [vmem:[%s2488_s12] ss:$0 sm:$0xff] }
 0x6cb   :  { %1923 = verf.f32 %v984_v27 }
 0x6cc   :  { %1925 = verf.f32 %v983_v28 }
 0x6d5   :  { %v1924_v29 = vpop.eup %1923 }
 0x6d6   :  { %v1926_v30 = vpop.eup %1925  ;;  %v988_v31 = vadd.f32 1.0, %v1924_v29 }
 0x6d7   :  { %v987_v33 = vadd.f32 1.0, %v1926_v30 }
 0x6d8   :  { %v990_v36 = vmul.f32 %v988_v31, %v982_v34 }
 0x6d9   :  { %v989_v35 = vmul.f32 %v987_v33, %v981_v32 }
 0x6db   :  { %1636 = vmatprep.mubr.f32.mxu1 %v989_v35 }
 0x6dc   :  { %1637 = vmatmul.mubr.f32.vlgmr.msra.gmra.mrb[12].mxu1 %v990_v36 }
 0x7af   :  { %v1638_v38 = vpop.f32.mrb[12].mxu1 }
 0x7b0   :  { %v1086_v39 = vadd.f32 %v1638_v38, %v1271_v37  ;;  %v1080_v40 = vpop.f32.mrb[13].mxu1 }
 0x7b1   :  { %v1081_v41 = vadd.f32 %v1271_v37, %v1080_v40 }
 0x7b2   :  { %v2440_v42 = vadd.f32 %v1086_v39, %v882_v7 }
 0x7b3   :  { %v2442_v43 = vadd.f32 %v1081_v41, %v881_v6  ;;  %v1894_v6 = vpack.c.bf16 %v1160_v5, %v1159_v4 }
 0x7b4   :  { %1095 = vadd.xlane.f32.xlu1 %v2440_v42  ;;  %v1100_v44 = vmul.f32 %v2440_v42, %v2440_v42 }
 0x7b5   :  { %1093 = vadd.xlane.f32.xlu0 %v2442_v43  ;;  %v1099_v45 = vmul.f32 %v2442_v43, %v2442_v43  ;;  %1895 = vmatprep.subr.bf16.mxu0 %v1894_v6 }
 0x7b6   :  { %1897 = vmatpush3.bf16.msra.mxu0 %v1894_v6 }
 0x7b8   :  { %1103 = vadd.xlane.f32.xlu1 %v1100_v44 }
 0x7b9   :  { %1101 = vadd.xlane.f32.xlu0 %v1099_v45 }
 0x841   :  { %v1096_v7 = vpop.xlane.xlu1 %1095 }
 0x842   :  { %v1098_v8 = vmul.f32 0.03125, %v1096_v7  ;;  %v1094_v9 = vpop.xlane.xlu0 %1093 }
 0x843   :  { %v1097_v10 = vmul.f32 0.03125, %v1094_v9 }
 0x844   :  { %v1108_v12 = vmul.f32 %v1098_v8, %v1098_v8  ;;  %v1112_v19 = vsub.f32 %v2440_v42, %v1098_v8  ;;  %v1274_v42 = vld [vmem:[%s2490_s14] ss:$0 sm:$0xff] }
 0x845   :  { %v1104_v11 = vpop.xlane.xlu1 %1103  ;;  %v1107_v15 = vmul.f32 %v1097_v10, %v1097_v10  ;;  %v1111_v21 = vsub.f32 %v2442_v43, %v1097_v10 }
 0x846   :  { %v1106_v13 = vmul.f32 0.03125, %v1104_v11  ;;  %v1102_v14 = vpop.xlane.xlu0 %1101 }
 0x847   :  { %v1105_v16 = vmul.f32 0.03125, %v1102_v14 }
 0x848   :  { %v1110_v17 = vsub.f32 %v1106_v13, %v1108_v12 }
 0x849   :  { %v1109_v49 = vsub.f32 %v1105_v16, %v1107_v15 }
 0x84a   :  { %v1114_v18 = vadd.f32 1e-12, %v1110_v17 }
 0x84b   :  { %v1113_v26 = vadd.f32 1e-12, %v1109_v49 }
 0x84c   :  { %1927 = vrsqrt.f32 %v1114_v18 }
 0x84d   :  { %1929 = vrsqrt.f32 %v1113_v26 }
 0x856   :  { %v1928_v20 = vpop.eup %1927 }
 0x857   :  { %v1930_v23 = vpop.eup %1929  ;;  %v1118_v24 = vmul.f32 %v1928_v20, %v1112_v19 }
 0x858   :  { %v1117_v27 = vmul.f32 %v1930_v23, %v1111_v21 }
 0x859   :  { %v1126_v28 = vmul.f32 %v1272_v22, %v1118_v24 }
 0x85a   :  { %v1125_v29 = vmul.f32 %v1272_v22, %v1117_v27 }
 0x85b   :  { %v1134_v30 = vadd.f32 %v1273_v25, %v1126_v28 }
 0x85c   :  { %v1133_v31 = vadd.f32 %v1273_v25, %v1125_v29 }
 0x85d   :  { %v1138_v32 = vmul.f32 0.70710677, %v1134_v30  ;;  %v1136_v39 = vmul.f32 0.5, %v1134_v30 }
 0x85e   :  { %v1137_v33 = vmul.f32 0.70710677, %v1133_v31  ;;  %v1135_v37 = vmul.f32 0.5, %v1133_v31 }
 0x85f   :  { %1931 = verf.f32 %v1138_v32 }
 0x860   :  { %1933 = verf.f32 %v1137_v33 }
 0x869   :  { %v1932_v34 = vpop.eup %1931 }
 0x86a   :  { %v1934_v35 = vpop.eup %1933  ;;  %v1142_v36 = vadd.f32 1.0, %v1932_v34 }
 0x86b   :  { %v1141_v38 = vadd.f32 1.0, %v1934_v35 }
 0x86c   :  { %v1144_v41 = vmul.f32 %v1142_v36, %v1136_v39 }
 0x86d   :  { %v1143_v40 = vmul.f32 %v1141_v38, %v1135_v37 }
 0x86f   :  { %1671 = vmatprep.mubr.f32.mxu0 %v1143_v40 }
 0x870   :  { %1672 = vmatmul.mubr.f32.vlgmr.msra.gmra.mrb[6].mxu0 %v1144_v41 }
 0x943   :  { %v1673_v43 = vpop.f32.mrb[6].mxu0 }
 0x944   :  { %v1240_v44 = vadd.f32 %v1673_v43, %v1274_v42  ;;  %v1234_v45 = vpop.f32.mrb[7].mxu0 }
 0x945   :  { %v1235_v46 = vadd.f32 %v1274_v42, %v1234_v45 }
 0x946   :  { %1244 = vst [vmem:[#allocation16 + $0x8] sm:$0xff] %v1240_v44 }
 0x947   :  { %1243 = vst [vmem:[#allocation16] sm:$0xff] %v1235_v46 }
 0x948   :  { %2122 = shalt.err (!%p2119_p12)
}
 0x949   :  { %s2123_s14 = scalar_lea.hbm %s2491_s15, 256 }
 0x94a   :  { %p2124_p13 = scmp.ne.s32.totalorder %s2491_s15, %s2123_s14  ;;  %p2127_p0 = scmp.lt.u32.totalorder %s2123_s14, %s2491_s15 }
 0x94c   :  { %p2129_p1 = pnand %p2127_p0, %p2124_p13 }
 0x94e   :  { %2132 = shalt.err (!%p2129_p1)
}
 0x94f   :  { %1256 = dma.vmem_to_hbm [thread:$0]  %s1251_s21, 256, %s2491_s15, [#allocation4], %s2147_s30, %s2147_s30, %s2148_s16  }
 0x950   :  { %2143 = dma.done.wait [#allocation4], 256  }
 0x951   :  { %2144 = vsyncadd [#allocation4], 4294967040 }
 0x952   :  { %1260 = vsyncpa [#allocation3], 1 }
 0x953   :  { %1261 = vsyncpa [#allocation6], 1 }
 0x954   :  { %1262 = vsyncpa [#allocation9], 1 }
 0x955   :  { %1263 = vsyncpa [#allocation12], 1 }
 0x956   :  { %1264 = vsyncpa [#allocation15], 1 }
 0x957   :  { %1265 = vsyncpa [#allocation4], 1 }

</bundles_post_ra>
